<compile_context>
chip_gen: v7x
topology: tpu7x:2x2x1
jax: 0.10.0
libtpu: 0.0.40
codegen_flags: <defaults>
</compile_context>

<pallas_src>
import functools

import jax
import jax.numpy as jnp
from jax.experimental import pallas as pl
from jax.experimental.pallas import tpu as pltpu


def policy_kernel(x_ref, w1_ref, b1_ref, w2_ref, b2_ref, w3_ref, b3_ref, o_ref):
    bf16 = jnp.bfloat16
    # Layer 1: Linear (bf16 MXU, f32 accumulate) + bias/ReLU in f32 (VPU)
    h1 = jnp.dot(x_ref[...].astype(bf16), w1_ref[...],
                 preferred_element_type=jnp.float32)
    h1 = jnp.maximum(h1 + b1_ref[...], 0.0)
    # Layer 2: Linear + ReLU
    h2 = jnp.dot(h1.astype(bf16), w2_ref[...],
                 preferred_element_type=jnp.float32)
    h2 = jnp.maximum(h2 + b2_ref[...], 0.0)
    # Layer 3: Linear (lane-dense padded width) + Tanh (EUP, f32)
    h3 = jnp.dot(h2.astype(bf16), w3_ref[...],
                 preferred_element_type=jnp.float32)
    o_ref[...] = jnp.tanh(h3 + b3_ref[...]).astype(o_ref.dtype)


def _round_up(n, m):
    return ((n + m - 1) // m) * m


@jax.jit
def policy_forward(x, w1, b1, w2, b2, w3, b3):
    B, F = x.shape
    H = w1.shape[1]                      # hidden = 128
    out_size = w3.shape[1]
    OUT_PAD = _round_up(out_size, 128)   # lane-dense output width

    # Batch tile: multiple of 8 sublanes, capped at 1024 rows.
    TB = min(1024, _round_up(B, 8))
    B_pad = _round_up(B, TB)

    bf16 = jnp.bfloat16
    # bf16 weights for the MXU; biases stay f32 for the VPU/EUP path.
    w1b = w1.astype(bf16)
    w2b = w2.astype(bf16)
    w3b = jnp.zeros((H, OUT_PAD), bf16).at[:, :out_size].set(w3.astype(bf16))
    b3p = jnp.zeros((1, OUT_PAD), jnp.float32).at[:, :out_size].set(b3)

    x_pad = jnp.pad(x, ((0, B_pad - B), (0, 0)))

    grid = (B_pad // TB,)
    resident = lambda shape: pl.BlockSpec(shape, lambda i: (0, 0))

    out_pad = pl.pallas_call(
        policy_kernel,
        out_shape=jax.ShapeDtypeStruct((B_pad, OUT_PAD), jnp.float32),
        grid=grid,
        in_specs=[
            pl.BlockSpec((TB, F), lambda i: (i, 0)),   # x: tiled over batch
            resident((F, H)), resident((1, H)),        # w1, b1 (VMEM-resident)
            resident((H, H)), resident((1, H)),        # w2, b2
            resident((H, OUT_PAD)), resident((1, OUT_PAD)),  # w3, b3 (padded)
        ],
        out_specs=pl.BlockSpec((TB, OUT_PAD), lambda i: (i, 0)),
        compiler_params=pltpu.CompilerParams(
            dimension_semantics=("parallel",)),
    )(x_pad, w1b, b1, w2b, b2, w3b, b3p)

    return out_pad[:B, :out_size]


def init_params(key, input_size, output_size, param_init_value):
    """Deterministic init mimicking the PyTorch module's __init__ (f32)."""
    k1w, k1b, k2w, k2b, k3w, k3b = jax.random.split(key, 6)
    # nn.Linear default init: U(-1/sqrt(fan_in), 1/sqrt(fan_in))
    bound1 = 1.0 / jnp.sqrt(float(input_size))
    w1 = jax.random.uniform(k1w, (input_size, 128), jnp.float32, -bound1, bound1)
    b1 = jax.random.uniform(k1b, (1, 128), jnp.float32, -bound1, bound1)
    bound2 = 1.0 / jnp.sqrt(128.0)
    w2 = jax.random.uniform(k2w, (128, 128), jnp.float32, -bound2, bound2)
    b2 = jax.random.uniform(k2b, (1, 128), jnp.float32, -bound2, bound2)
    # layers[4] overridden: U(-param_init_value, param_init_value)
    w3 = jax.random.uniform(k3w, (128, output_size), jnp.float32,
                            -param_init_value, param_init_value)
    b3 = jax.random.uniform(k3b, (1, output_size), jnp.float32,
                            -param_init_value, param_init_value)
    return w1, b1, w2, b2, w3, b3


def reference_forward(x, w1, b1, w2, b2, w3, b3):
    """bf16-matmul / f32-elementwise reference matching the kernel's math."""
    bf16 = jnp.bfloat16
    h1 = jnp.dot(x.astype(bf16), w1.astype(bf16),
                 preferred_element_type=jnp.float32)
    h1 = jnp.maximum(h1 + b1, 0.0)
    h2 = jnp.dot(h1.astype(bf16), w2.astype(bf16),
                 preferred_element_type=jnp.float32)
    h2 = jnp.maximum(h2 + b2, 0.0)
    h3 = jnp.dot(h2.astype(bf16), w3.astype(bf16),
                 preferred_element_type=jnp.float32)
    return jnp.tanh(h3 + b3)


if __name__ == "__main__":
    input_size = 16
    output_size = 8
    batch = 8
    param_init_value = 3e-3

    key = jax.random.PRNGKey(0)
    kx, kp = jax.random.split(key)
    x = jax.random.normal(kx, (batch, input_size), dtype=jnp.float32)
    params = init_params(kp, input_size, output_size, param_init_value)

    out = policy_forward(x, *params)
    out = jax.block_until_ready(out)

    ref = reference_forward(x, *params)
    assert out.shape == (batch, output_size)
    assert jnp.allclose(out, ref, atol=1e-4, rtol=1e-3), (
        float(jnp.max(jnp.abs(out - ref))))

    print("KERNEL_OK")
</pallas_src>

<mosaic_0001>
module attributes {stable_mosaic.version = 11 : i64} {
  func.func @policy_kernel(%arg0: i32, %arg1: memref<8x16xf32, #tpu.memory_space<vmem>>, %arg2: memref<16x128xbf16, #tpu.memory_space<vmem>>, %arg3: memref<1x128xf32, #tpu.memory_space<vmem>>, %arg4: memref<128x128xbf16, #tpu.memory_space<vmem>>, %arg5: memref<1x128xf32, #tpu.memory_space<vmem>>, %arg6: memref<128x128xbf16, #tpu.memory_space<vmem>>, %arg7: memref<1x128xf32, #tpu.memory_space<vmem>>, %arg8: memref<8x128xf32, #tpu.memory_space<vmem>>) attributes {dimension_semantics = [#tpu.dimension_semantics<parallel>], iteration_bounds = array<i64: 1>, scalar_prefetch = 0 : i64, scratch_operands = 0 : i64, tpu.core_type = #tpu.core_type<tc>, window_params = [{transform_indices = @transform_0, window_bounds = array<i64: 8, 16>}, {pipeline_mode = #tpu.pipeline_mode<synchronous>, transform_indices = @transform_1, window_bounds = array<i64: 16, 128>}, {pipeline_mode = #tpu.pipeline_mode<synchronous>, transform_indices = @transform_2, window_bounds = array<i64: 1, 128>}, {pipeline_mode = #tpu.pipeline_mode<synchronous>, transform_indices = @transform_3, window_bounds = array<i64: 128, 128>}, {pipeline_mode = #tpu.pipeline_mode<synchronous>, transform_indices = @transform_4, window_bounds = array<i64: 1, 128>}, {pipeline_mode = #tpu.pipeline_mode<synchronous>, transform_indices = @transform_5, window_bounds = array<i64: 128, 128>}, {pipeline_mode = #tpu.pipeline_mode<synchronous>, transform_indices = @transform_6, window_bounds = array<i64: 1, 128>}, {transform_indices = @transform_7, window_bounds = array<i64: 8, 128>}]} {
    %c0 = arith.constant 0 : index
    %c0_0 = arith.constant 0 : index
    %0 = vector.load %arg1[%c0, %c0_0] : memref<8x16xf32, #tpu.memory_space<vmem>>, vector<8x16xf32>
    %1 = arith.truncf %0 : vector<8x16xf32> to vector<8x16xbf16>
    %c0_1 = arith.constant 0 : index
    %c0_2 = arith.constant 0 : index
    %2 = vector.load %arg2[%c0_1, %c0_2] : memref<16x128xbf16, #tpu.memory_space<vmem>>, vector<16x128xbf16>
    %cst = arith.constant dense<0.000000e+00> : vector<8x128xf32>
    %3 = tpu.matmul %1, %2, %cst {dimension_numbers = #tpu.dot_dimension_numbers<[1], [0], [0], [1], [0, 0, 1, 1], [], []>} : vector<8x16xbf16>, vector<16x128xbf16>, vector<8x128xf32> -> vector<8x128xf32>
    %c0_3 = arith.constant 0 : index
    %c0_4 = arith.constant 0 : index
    %4 = vector.load %arg3[%c0_3, %c0_4] : memref<1x128xf32, #tpu.memory_space<vmem>>, vector<1x128xf32>
    %5 = vector.broadcast %4 : vector<1x128xf32> to vector<8x128xf32>
    %6 = arith.addf %3, %5 : vector<8x128xf32>
    %cst_5 = arith.constant 0.000000e+00 : f32
    %7 = vector.broadcast %cst_5 : f32 to vector<8x128xf32>
    %8 = arith.maximumf %6, %7 : vector<8x128xf32>
    %9 = arith.truncf %8 : vector<8x128xf32> to vector<8x128xbf16>
    %c0_6 = arith.constant 0 : index
    %c0_7 = arith.constant 0 : index
    %10 = vector.load %arg4[%c0_6, %c0_7] : memref<128x128xbf16, #tpu.memory_space<vmem>>, vector<128x128xbf16>
    %cst_8 = arith.constant dense<0.000000e+00> : vector<8x128xf32>
    %11 = tpu.matmul %9, %10, %cst_8 {dimension_numbers = #tpu.dot_dimension_numbers<[1], [0], [0], [1], [0, 0, 1, 1], [], []>} : vector<8x128xbf16>, vector<128x128xbf16>, vector<8x128xf32> -> vector<8x128xf32>
    %c0_9 = arith.constant 0 : index
    %c0_10 = arith.constant 0 : index
    %12 = vector.load %arg5[%c0_9, %c0_10] : memref<1x128xf32, #tpu.memory_space<vmem>>, vector<1x128xf32>
    %13 = vector.broadcast %12 : vector<1x128xf32> to vector<8x128xf32>
    %14 = arith.addf %11, %13 : vector<8x128xf32>
    %cst_11 = arith.constant 0.000000e+00 : f32
    %15 = vector.broadcast %cst_11 : f32 to vector<8x128xf32>
    %16 = arith.maximumf %14, %15 : vector<8x128xf32>
    %17 = arith.truncf %16 : vector<8x128xf32> to vector<8x128xbf16>
    %c0_12 = arith.constant 0 : index
    %c0_13 = arith.constant 0 : index
    %18 = vector.load %arg6[%c0_12, %c0_13] : memref<128x128xbf16, #tpu.memory_space<vmem>>, vector<128x128xbf16>
    %cst_14 = arith.constant dense<0.000000e+00> : vector<8x128xf32>
    %19 = tpu.matmul %17, %18, %cst_14 {dimension_numbers = #tpu.dot_dimension_numbers<[1], [0], [0], [1], [0, 0, 1, 1], [], []>} : vector<8x128xbf16>, vector<128x128xbf16>, vector<8x128xf32> -> vector<8x128xf32>
    %c0_15 = arith.constant 0 : index
    %c0_16 = arith.constant 0 : index
    %20 = vector.load %arg7[%c0_15, %c0_16] : memref<1x128xf32, #tpu.memory_space<vmem>>, vector<1x128xf32>
    %21 = vector.broadcast %20 : vector<1x128xf32> to vector<8x128xf32>
    %22 = arith.addf %19, %21 : vector<8x128xf32>
    %23 = math.tanh %22 : vector<8x128xf32>
    %c0_17 = arith.constant 0 : index
    %c0_18 = arith.constant 0 : index
    %24 = vector.load %arg8[%c0_17, %c0_18] : memref<8x128xf32, #tpu.memory_space<vmem>>, vector<8x128xf32>
    tpu.vector_store %arg8[%c0_17, %c0_18], %23 {strides = array<i32>} : memref<8x128xf32, #tpu.memory_space<vmem>>, vector<8x128xf32>,
    return
  }
  func.func @transform_0(%arg0: i32) -> (i32, i32) {
    %c0_i32 = arith.constant 0 : i32
    %c0_i32_0 = arith.constant 0 : i32
    return %arg0, %c0_i32 : i32, i32
  }
  func.func @transform_1(%arg0: i32) -> (i32, i32) {
    %c0_i32 = arith.constant 0 : i32
    %c0_i32_0 = arith.constant 0 : i32
    %c0_i32_1 = arith.constant 0 : i32
    return %c0_i32, %c0_i32_0 : i32, i32
  }
  func.func @transform_2(%arg0: i32) -> (i32, i32) {
    %c0_i32 = arith.constant 0 : i32
    %c0_i32_0 = arith.constant 0 : i32
    %c0_i32_1 = arith.constant 0 : i32
    return %c0_i32, %c0_i32_0 : i32, i32
  }
  func.func @transform_3(%arg0: i32) -> (i32, i32) {
    %c0_i32 = arith.constant 0 : i32
    %c0_i32_0 = arith.constant 0 : i32
    %c0_i32_1 = arith.constant 0 : i32
    return %c0_i32, %c0_i32_0 : i32, i32
  }
  func.func @transform_4(%arg0: i32) -> (i32, i32) {
    %c0_i32 = arith.constant 0 : i32
    %c0_i32_0 = arith.constant 0 : i32
    %c0_i32_1 = arith.constant 0 : i32
    return %c0_i32, %c0_i32_0 : i32, i32
  }
  func.func @transform_5(%arg0: i32) -> (i32, i32) {
    %c0_i32 = arith.constant 0 : i32
    %c0_i32_0 = arith.constant 0 : i32
    %c0_i32_1 = arith.constant 0 : i32
    return %c0_i32, %c0_i32_0 : i32, i32
  }
  func.func @transform_6(%arg0: i32) -> (i32, i32) {
    %c0_i32 = arith.constant 0 : i32
    %c0_i32_0 = arith.constant 0 : i32
    %c0_i32_1 = arith.constant 0 : i32
    return %c0_i32, %c0_i32_0 : i32, i32
  }
  func.func @transform_7(%arg0: i32) -> (i32, i32) {
    %c0_i32 = arith.constant 0 : i32
    %c0_i32_0 = arith.constant 0 : i32
    return %arg0, %c0_i32 : i32, i32
  }
}

</mosaic_0001>

<bundles_post_ra>
// kernel: policy_forward.1
= control target key start
LH: loop header
LB: loop body
LE: loop exit
PB: predicated region body
PF: predicated region fallthrough
CT: control target
= control target key end

     0   :  { %v464_v1 = vmov 0.0   ;;  %vm45_vm0 = vcmask 130048   ;;  %vm465_vm1 = vmmov 0   ;;  %s602_s0 = inlined_call_operand.vmem [shape: f32[8,16], index: 0, kind: input, shape index: {}]   ;;  %s603_s1 = inlined_call_operand.vmem [shape: bf16[16,128], index: 1, kind: input, shape index: {}]   ;;  %s604_s2 = inlined_call_operand.vmem [shape: f32[1,128], index: 2, kind: input, shape index: {}]   ;;  %s605_s3 = inlined_call_operand.vmem [shape: bf16[128,128], index: 3, kind: input, shape index: {}]   ;;  %s606_s4 = inlined_call_operand.vmem [shape: f32[1,128], index: 4, kind: input, shape index: {}]   ;;  %s607_s5 = inlined_call_operand.vmem [shape: bf16[128,128], index: 5, kind: input, shape index: {}]   ;;  %s608_s6 = inlined_call_operand.vmem [shape: f32[1,128], index: 6, kind: input, shape index: {}]   ;;  %s609_s7 = inlined_call_operand.hbm [shape: f32[8,128], index: 7, kind: output, shape index: {}]  }
   0x1   :  { %v421_v0 = vld [vmem:[%s603_s1] sm:$0xff]   ;;  %372 = vmatprep.subr.bf16.mxu0 %v464_v1  ;;  %378 = vmatprep.subr.bf16.mxu1 %v464_v1  ;;  %v423_v5 = vld [vmem:[%s605_s3 + $0x8] sm:$0xff]   ;;  %v424_v6 = vld [vmem:[%s605_s3 + $0x10] sm:$0xff]  }
   0x2   :  { %v28_v2 = vld [vmem:[%s602_s0] sm:$0xff]  ;;  %373 = vmatpush3.bf16.msra.mxu0 %v421_v0  ;;  %374 = vmatprep.mubr.msk.bf16.mxu0 %vm465_vm1, %v464_v1  ;;  %v425_v7 = vld [vmem:[%s605_s3 + $0x18] sm:$0xff]  }
   0x3   :  { %v422_v3 = vld [vmem:[%s605_s3] sm:$0xff]   ;;  %v29_v4 = vpack.c.bf16 %v28_v2, %v28_v2  ;;  %394 = vmatprep.mubr.msk.bf16.mxu1 %vm465_vm1, %v464_v1  ;;  %398 = vmatprep.subr.bf16.mxu0 %v464_v1 }
   0x4   :  { %379 = vmatpush3.bf16.msra.mxu1 %v422_v3 }
   0x5   :  { %380 = vmatprep.subr.bf16.mxu1 %v464_v1  ;;  %375 = vmatmul.mubr.msk.bf16.vlgmr.msra.gmra.mrb[0].mxu0 %vm45_vm0, %v29_v4 }
   0x6   :  { %414 = vmatprep.mubr.msk.bf16.mxu0 %vm465_vm1, %v464_v1 }
   0x8   :  { %381 = vmatpush3.bf16.msra.mxu1 %v423_v5 }
   0x9   :  { %382 = vmatprep.subr.bf16.mxu1 %v464_v1 }
   0xc   :  { %383 = vmatpush3.bf16.msra.mxu1 %v424_v6 }
   0xd   :  { %384 = vmatprep.subr.bf16.mxu1 %v464_v1 }
   0xe   :  { %12 = vsyncpa [#allocation3], 0  ;;  %v426_v8 = vld [vmem:[%s605_s3 + $0x20] sm:$0xff]   ;;  %v427_v9 = vld [vmem:[%s605_s3 + $0x28] sm:$0xff]  }
   0xf   :  { %v428_v10 = vld [vmem:[%s605_s3 + $0x30] sm:$0xff]   ;;  %v429_v11 = vld [vmem:[%s605_s3 + $0x38] sm:$0xff]   ;;  %v430_v12 = vld [vmem:[%s607_s5] sm:$0xff]  }
  0x10   :  { %385 = vmatpush3.bf16.msra.mxu1 %v425_v7  ;;  %399 = vmatpush3.bf16.msra.mxu0 %v430_v12  ;;  %v431_v13 = vld [vmem:[%s607_s5 + $0x8] sm:$0xff]   ;;  %v432_v14 = vld [vmem:[%s607_s5 + $0x10] sm:$0xff]   ;;  %v433_v15 = vld [vmem:[%s607_s5 + $0x18] sm:$0xff]  }
  0x11   :  { %386 = vmatprep.subr.bf16.mxu1 %v464_v1  ;;  %400 = vmatprep.subr.bf16.mxu0 %v464_v1  ;;  %v434_v16 = vld [vmem:[%s607_s5 + $0x20] sm:$0xff]   ;;  %v435_v17 = vld [vmem:[%s607_s5 + $0x28] sm:$0xff]   ;;  %v436_v26 = vld [vmem:[%s607_s5 + $0x30] sm:$0xff]  }
  0x12   :  { %v331_v18 = vld [vmem:[%s604_s2] ss:$0 sm:$0xff]  ;;  %v437_v27 = vld [vmem:[%s607_s5 + $0x38] sm:$0xff]   ;;  %s466_s5 = smov [#allocation2]  }
  0x13   :  { %v334_v28 = vld [vmem:[%s606_s4] ss:$0 sm:$0xff]  ;;  %s323_s4 = sshll.u32 %s466_s5, 4  ;;  %s324_s4 = int_to_ptr.vmem [resolvable:$true] %s323_s4 }
  0x14   :  { %387 = vmatpush3.bf16.msra.mxu1 %v426_v8  ;;  %401 = vmatpush3.bf16.msra.mxu0 %v431_v13  ;;  %v343_v36 = vld [vmem:[%s608_s6] ss:$0 sm:$0xff]  ;;  %s440_s14 = scalar_lea.vmem %s324_s4, 128  ;;  %p445_p1 = scmp.lt.s32.totalorder %s324_s4, %s324_s4 }
  0x15   :  { %388 = vmatprep.subr.bf16.mxu1 %v464_v1  ;;  %402 = vmatprep.subr.bf16.mxu0 %v464_v1  ;;  %p441_p0 = scmp.ne.s32.totalorder %s324_s4, %s440_s14  ;;  %p446_p2 = scmp.lt.s32.totalorder %s440_s14, %s440_s14 }
  0x17   :  { %p447_p3 = por %p446_p2, %p445_p1 }
  0x18   :  { %389 = vmatpush3.bf16.msra.mxu1 %v427_v9  ;;  %403 = vmatpush3.bf16.msra.mxu0 %v432_v14 }
  0x19   :  { %390 = vmatprep.subr.bf16.mxu1 %v464_v1  ;;  %404 = vmatprep.subr.bf16.mxu0 %v464_v1  ;;  %p448_p4 = pnand %p447_p3, %p441_p0 }
  0x1c   :  { %391 = vmatpush3.bf16.msra.mxu1 %v428_v10  ;;  %405 = vmatpush3.bf16.msra.mxu0 %v433_v15 }
  0x1d   :  { %392 = vmatprep.subr.bf16.mxu1 %v464_v1  ;;  %406 = vmatprep.subr.bf16.mxu0 %v464_v1 }
  0x20   :  { %393 = vmatpush3.bf16.msra.mxu1 %v429_v11  ;;  %407 = vmatpush3.bf16.msra.mxu0 %v434_v16 }
  0x21   :  { %408 = vmatprep.subr.bf16.mxu0 %v464_v1 }
  0x24   :  { %409 = vmatpush3.bf16.msra.mxu0 %v435_v17 }
  0x25   :  { %410 = vmatprep.subr.bf16.mxu0 %v464_v1 }
  0x28   :  { %411 = vmatpush3.bf16.msra.mxu0 %v436_v26 }
  0x29   :  { %412 = vmatprep.subr.bf16.mxu0 %v464_v1 }
  0x2c   :  { %413 = vmatpush3.bf16.msra.mxu0 %v437_v27 }
  0xd8   :  { %v83_v19 = vpop.f32.mrb[0].mxu0 }
  0xd9   :  { %v84_v20 = vadd.f32 %v331_v18, %v83_v19  ;;  %v376_v21 = vpop.f32.mrb[1].mxu0 }
  0xda   :  { %v86_v22 = vpop.f32.mrb[2].mxu0 }
  0xdb   :  { %v89_v23 = vmax.f32 %v84_v20, 0.0  ;;  %v377_v24 = vpop.f32.mrb[3].mxu0 }
  0xdd   :  { %v90_v25 = vpack.c.bf16 %v89_v23, %v89_v23 }
  0xdf   :  { %395 = vmatmul.mubr.bf16.vlgmr.msra.gmra.mrb[0].mxu1 %v90_v25 }
 0x1b2   :  { %v196_v29 = vpop.f32.mrb[0].mxu1 }
 0x1b3   :  { %v197_v30 = vadd.f32 %v334_v28, %v196_v29  ;;  %v396_v31 = vpop.f32.mrb[1].mxu1 }
 0x1b4   :  { %v199_v32 = vpop.f32.mrb[2].mxu1 }
 0x1b5   :  { %v202_v33 = vmax.f32 %v197_v30, 0.0  ;;  %v397_v34 = vpop.f32.mrb[3].mxu1 }
 0x1b7   :  { %v203_v35 = vpack.c.bf16 %v202_v33, %v202_v33 }
 0x1b9   :  { %415 = vmatmul.mubr.bf16.vlgmr.msra.gmra.mrb[4].mxu0 %v203_v35 }
 0x28c   :  { %v309_v37 = vpop.f32.mrb[4].mxu0 }
 0x28d   :  { %v310_v38 = vadd.f32 %v343_v36, %v309_v37  ;;  %v416_v39 = vpop.f32.mrb[5].mxu0 }
 0x28e   :  { %v312_v40 = vpop.f32.mrb[6].mxu0 }
 0x28f   :  { %438 = vtanh.f32 %v310_v38  ;;  %v417_v41 = vpop.f32.mrb[7].mxu0 }
 0x299   :  { %v439_v42 = vpop.eup %438 }
 0x29a   :  { %316 = vst [vmem:[#allocation2] sm:$0xff] %v439_v42 }
 0x29b   :  { %451 = shalt.err (!%p448_p4)
}
 0x29c   :  { %s452_s16 = scalar_lea.hbm %s609_s7, 128 }
 0x29d   :  { %p453_p5 = scmp.ne.s32.totalorder %s609_s7, %s452_s16  ;;  %p456_p6 = scmp.lt.u32.totalorder %s452_s16, %s609_s7 }
 0x29f   :  { %p458_p7 = pnand %p456_p6, %p453_p5 }
 0x2a1   :  { %461 = shalt.err (!%p458_p7)
}
 0x2a2   :  { %326 = dma.vmem_to_hbm [thread:$0]  %s324_s4, 128, %s609_s7, [#allocation3]  }
 0x2a3   :  { %462 = dma.done.wait [#allocation3], 128  }
 0x2a4   :  { %463 = vsyncadd [#allocation3], 4294967168 }
 0x2a5   :  { %330 = vsyncpa [#allocation3], 1 }

</bundles_post_ra>
